<compile_context>
chip_gen: v7x
topology: tpu7x:2x2x1
jax: 0.10.0
libtpu: 0.0.40
codegen_flags: <defaults>
</compile_context>

<pallas_src>
import jax
import jax.numpy as jnp
from jax.experimental import pallas as pl
from jax.experimental.pallas import tpu as pltpu


def _round_up(x, m):
    return (x + m - 1) // m * m


def _nact_kernel(x_ref, noise_ref, mask_ref, o_ref):
    # x_ref:     (tile_rows, tile_f)  activation tile
    # noise_ref: (1, tile_f)          per-feature noise (broadcast over rows)
    # mask_ref:  (1, tile_f)          per-feature mask  (broadcast over rows)
    # Promotion happens in-kernel (VALU is free filler for an HBM-bound op);
    # single cast at the store.
    o_ref[...] = (x_ref[...] + noise_ref[...] * mask_ref[...]).astype(o_ref.dtype)


def nact_forward_pallas(x, noise, mask, *, donate_x=False):
    """Pallas path. x: (..., *size); noise/mask: size. Returns x + noise*mask."""
    orig_shape = x.shape
    feat = noise.size
    n = x.size // feat  # all leading dims flattened into the batch axis

    out_dtype = jnp.result_type(x.dtype, noise.dtype, mask.dtype)
    in_isz = jnp.dtype(x.dtype).itemsize
    out_isz = jnp.dtype(out_dtype).itemsize
    buf_isz = max(in_isz, out_isz)
    # Sublane pack of the (narrower) input dtype; always a multiple of 8.
    sublane = {1: 32, 2: 16}.get(in_isz, 8)

    x2 = x.reshape(n, feat)
    nz2 = noise.reshape(1, feat)
    mk2 = mask.reshape(1, feat)

    # ---- Tile sizing: ~8 MiB for the largest buffer per grid step. -------
    # Double-buffered in + out => ~32 MiB (+ tiny resident noise/mask),
    # safe on v5e/v6e (128 MiB VMEM) and v7x (64 MiB VMEM per TC).
    target_tile_bytes = 8 * 1024 * 1024
    max_tile_elems = max(sublane * 128, target_tile_bytes // buf_isz)

    # Feature tile: full extent unless even one sublane-pack of full-width
    # rows busts the budget, in which case tile F in 128-lane multiples.
    if sublane * feat <= max_tile_elems:
        tile_f = feat
    else:
        tile_f = max(128, (max_tile_elems // sublane) // 128 * 128)

    # Row tile: as many sublane-packs as fit the budget (no 512-row cap).
    tile_rows = max(sublane, (max_tile_elems // tile_f) // sublane * sublane)

    # Guarantee >= 2 row steps when the batch is splittable (v7x: keeps both
    # TensorCores busy; all gens: lets in/out DMA overlap compute).
    if tile_rows >= n and n >= 2 * sublane:
        tile_rows = _round_up(pl.cdiv(n, 2), sublane)
    if tile_rows >= n:
        tile_rows = n  # full-extent row block: legal for any n, no OOB rows

    grid_rows = pl.cdiv(n, tile_rows)
    grid_f = pl.cdiv(feat, tile_f)

    # If rows could not be split, split the feature axis instead so the grid
    # still has >= 2 steps (only when the feature axis is wide enough).
    if grid_rows * grid_f < 2 and feat >= 256:
        tile_f = _round_up(pl.cdiv(feat, 2), 128)
        grid_f = pl.cdiv(feat, tile_f)

    io_aliases = {}
    if donate_x and x.dtype == out_dtype:
        io_aliases = {0: 0}

    out2 = pl.pallas_call(
        _nact_kernel,
        out_shape=jax.ShapeDtypeStruct((n, feat), out_dtype),
        grid=(grid_rows, grid_f),
        in_specs=[
            pl.BlockSpec((tile_rows, tile_f), lambda i, j: (i, j)),
            pl.BlockSpec((1, tile_f), lambda i, j: (0, j)),  # noise: row-resident
            pl.BlockSpec((1, tile_f), lambda i, j: (0, j)),  # mask:  row-resident
        ],
        out_specs=pl.BlockSpec((tile_rows, tile_f), lambda i, j: (i, j)),
        compiler_params=pltpu.CompilerParams(
            dimension_semantics=("parallel", "parallel"),
            vmem_limit_bytes=40 * 1024 * 1024,
        ),
        input_output_aliases=io_aliases,
    )(x2, nz2, mk2)

    return out2.reshape(orig_shape)


def nact_forward(x, noise, mask, *, min_pallas_elems=1 << 16):
    """Size-based dispatch: tiny inputs use plain (fused) XLA, large go Pallas."""
    if x.size < min_pallas_elems:
        return x + noise * mask
    return nact_forward_pallas(x, noise, mask)


if __name__ == "__main__":
    key = jax.random.PRNGKey(0)
    kx, kn = jax.random.split(key)

    # size = (C, H, W), batch N = 2  (NCHW activations, like the PyTorch use)
    N, C, H, W = 2, 4, 16, 16
    size = (C, H, W)

    x = jax.random.normal(kx, (N, C, H, W), dtype=jnp.float32)
    # Deterministic "set_noise(var=0.1)" equivalent.
    noise = jax.random.normal(kn, size, dtype=jnp.float32) * 0.1
    mask = jnp.ones(size, dtype=jnp.float32)

    # Exercise the Pallas path directly even at this small demo shape
    # (production callers should use nact_forward(), which dispatches by size).
    out = nact_forward_pallas(x, noise, mask)
    out = jax.block_until_ready(out)

    # Reference check (plain JAX, same semantics as PyTorch forward).
    ref = x + noise * mask
    assert out.shape == ref.shape and out.dtype == ref.dtype
    assert jnp.allclose(out, ref, atol=1e-6), "mismatch vs reference"

    print("KERNEL_OK")
</pallas_src>

<mosaic_0001>
module attributes {stable_mosaic.version = 11 : i64} {
  func.func @_nact_kernel(%arg0: i32, %arg1: i32, %arg2: memref<2x512xf32, #tpu.memory_space<vmem>>, %arg3: memref<1x512xf32, #tpu.memory_space<vmem>>, %arg4: memref<1x512xf32, #tpu.memory_space<vmem>>, %arg5: memref<2x512xf32, #tpu.memory_space<vmem>>) attributes {dimension_semantics = [#tpu.dimension_semantics<parallel>, #tpu.dimension_semantics<parallel>], iteration_bounds = array<i64: 1, 2>, scalar_prefetch = 0 : i64, scratch_operands = 0 : i64, tpu.core_type = #tpu.core_type<tc>, window_params = [{transform_indices = @transform_0, window_bounds = array<i64: 2, 512>}, {transform_indices = @transform_1, window_bounds = array<i64: 1, 512>}, {transform_indices = @transform_2, window_bounds = array<i64: 1, 512>}, {transform_indices = @transform_3, window_bounds = array<i64: 2, 512>}]} {
    %c0 = arith.constant 0 : index
    %c0_0 = arith.constant 0 : index
    %0 = vector.load %arg2[%c0, %c0_0] : memref<2x512xf32, #tpu.memory_space<vmem>>, vector<2x512xf32>
    %c0_1 = arith.constant 0 : index
    %c0_2 = arith.constant 0 : index
    %1 = vector.load %arg3[%c0_1, %c0_2] : memref<1x512xf32, #tpu.memory_space<vmem>>, vector<1x512xf32>
    %c0_3 = arith.constant 0 : index
    %c0_4 = arith.constant 0 : index
    %2 = vector.load %arg4[%c0_3, %c0_4] : memref<1x512xf32, #tpu.memory_space<vmem>>, vector<1x512xf32>
    %3 = arith.mulf %1, %2 : vector<1x512xf32>
    %4 = vector.broadcast %3 : vector<1x512xf32> to vector<2x512xf32>
    %5 = arith.addf %0, %4 : vector<2x512xf32>
    %c0_5 = arith.constant 0 : index
    %c0_6 = arith.constant 0 : index
    %6 = vector.load %arg5[%c0_5, %c0_6] : memref<2x512xf32, #tpu.memory_space<vmem>>, vector<2x512xf32>
    tpu.vector_store %arg5[%c0_5, %c0_6], %5 {strides = array<i32>} : memref<2x512xf32, #tpu.memory_space<vmem>>, vector<2x512xf32>,
    return
  }
  func.func @transform_0(%arg0: i32, %arg1: i32) -> (i32, i32) {
    %c0_i32 = arith.constant 0 : i32
    return %arg0, %arg1 : i32, i32
  }
  func.func @transform_1(%arg0: i32, %arg1: i32) -> (i32, i32) {
    %c0_i32 = arith.constant 0 : i32
    %c0_i32_0 = arith.constant 0 : i32
    return %c0_i32, %arg1 : i32, i32
  }
  func.func @transform_2(%arg0: i32, %arg1: i32) -> (i32, i32) {
    %c0_i32 = arith.constant 0 : i32
    %c0_i32_0 = arith.constant 0 : i32
    return %c0_i32, %arg1 : i32, i32
  }
  func.func @transform_3(%arg0: i32, %arg1: i32) -> (i32, i32) {
    %c0_i32 = arith.constant 0 : i32
    return %arg0, %arg1 : i32, i32
  }
}

</mosaic_0001>

<bundles_post_ra>
// kernel: tpu_custom_call.1
= control target key start
LH: loop header
LB: loop body
LE: loop exit
PB: predicated region body
PF: predicated region fallthrough
CT: control target
= control target key end

     0   :  { %s1034_s0 = inlined_call_operand.hbm [shape: f32[2,1024], index: 0, kind: input, shape index: {}]   ;;  %s1035_s1 = inlined_call_operand.hbm [shape: f32[1,1024], index: 1, kind: input, shape index: {}]   ;;  %s1036_s2 = inlined_call_operand.hbm [shape: f32[1,1024], index: 2, kind: input, shape index: {}]   ;;  %s1037_s3 = inlined_call_operand.hbm [shape: f32[2,1024], index: 3, kind: output, shape index: {}]  }
   0x1   :  { %1043 = sst [smem:[#allocation15_spill]] %s1035_s1 }
   0x2   :  { %8 = vsyncpa [#allocation3], 0 }
   0x3   :  { %10 = vsyncpa [#allocation3 + $0x1], 0 }
   0x4   :  { %11 = vsyncpa [#allocation6], 0 }
   0x5   :  { %13 = vsyncpa [#allocation6 + $0x1], 0 }
   0x6   :  { %14 = vsyncpa [#allocation4], 0 }
   0x7   :  { %16 = vsyncpa [#allocation4 + $0x1], 0  ;;  %s770_s12 = smov 0   ;;  %s772_s13 = smov 0  }
   0x8   :  { %s774_s14 = smov 0   ;;  %s776_s15 = smov 0  }
   0x9   :  { %s778_s16 = smov 0   ;;  %s780_s17 = smov 0  }
   0xa LB: > { %1044 = sst [smem:[#allocation12_spill]] %s739_s16  ;;  %s801_s18 = sadd.s32 4294967295, %s743_s17   ;;  %s743_s17 = sphi %s780_s17, %s22_s17   ;;  %s739_s16 = sphi %s778_s16, %s1063_s16   ;;  %s735_s15 = sphi %s776_s15, %s1062_s15   ;;  %s731_s14 = sphi %s774_s14, %s1066_s14   ;;  %s727_s13 = sphi %s772_s13, %s1065_s13   ;;  %s723_s12 = sphi %s770_s12, %s1064_s12  }
   0xb   : > { %s468_s19 = sadd.s32 4294967294, %s743_s17   ;;  %s31_s20 = sadd.s32 1, %s739_s16 }
   0xc   : > { %s43_s21 = sadd.s32 1, %s731_s14  ;;  %p32_p0 = scmp.ge.s32.totalorder %s31_s20, 2 }
   0xd   : > { %p50_p1 = scmp.ne.s32.totalorder %s731_s14, %s727_s13  ;;  %p51_p2 = scmp.eq.s32.totalorder %s743_s17, 0 }
   0xe   : > { %p56_p3 = scmp.ne.s32.totalorder %s727_s13, %s723_s12  ;;  %s1068_s20 = smov (%p32_p0, %s31_s20), 0 }
   0xf   : > { %1045 = sst [smem:[#allocation13_spill]] %s1068_s20  ;;  %p813_p4 = por %p51_p2, %p50_p1 }
  0x10   : > { %p57_p5 = scmp.eq.s32.totalorder %s801_s18, 0  ;;  %s39_s23 = ssub.s32 %s739_s16, %s1068_s20 }
  0x11   : > { %p134_p6 = scmp.eq.s32.totalorder %s801_s18, 1  ;;  %p41_p7 = scmp.eq.s32.totalorder %s39_s23, 0 }
  0x12   : > { %p821_p8 = por %p57_p5, %p56_p3  ;;  %p140_p10 = scmp.eq.s32.totalorder %s468_s19, 1 }
  0x13   : > { %p825_p9 = por %p134_p6, %p50_p1  ;;  %p516_p13 = scmp.lt.s32.totalorder %s743_s17, 2 }
  0x14   : > { %s1047_s24 = scalar_select %p821_p8, 1, 0 }
  0x15   : > { %s1048_s25 = scalar_select %p825_p9, 1, 0 }
  0x16   : > { %s830_s26 = scalar_select %p41_p7, %s731_s14, %s43_s21  }
  0x17   : > { %p832_p11 = por %p140_p10, %p56_p3  ;;  %s839_s28 = sand.u32 1, %s731_s14  }
  0x18   : > { %1049 = sst [smem:[#allocation14_spill]] %s830_s26  ;;  %s181_s29 = sand.u32 1, %s743_s17  }
  0x19   : > { %s1050_s27 = scalar_select %p832_p11, 1, 0 }
  0x1a   : > { %s1038_s30 = sshll.u32 %s839_s28, 2  ;;  %p845_p0 = pnand %p516_p13, %p813_p4 }
  0x1b   : > { %s491_s5 = sshll.u32 %s739_s16, 6  ;;  %s1052_s1 = sld [smem:[#allocation15_spill]] }
  0x1c   : > { %s185_s9 = scalar_lea.vmem [#allocation5], %s1038_s30  ;;  %s862_s21 = scalar_lea.hbm %s1036_s2, %s491_s5 }
  0x1d   : > { %s193_s10 = sshll.u32 %s185_s9, 4  ;;  %s864_s22 = scalar_lea.sflag [#allocation6], %s181_s29  ;;  %s857_s10 = int_to_ptr.vmem [resolvable:$true] %s193_s10 }
  0x1e   : > { %p870_p2 = pneg %p845_p0 }
  0x21   : > { %s853_s8 = scalar_lea.hbm %s1052_s1, %s491_s5  ;;  %s572_s30 = scalar_lea.hbm %s1052_s1, 128 }
  0x22   : > { %s567_s23 = scalar_lea.hbm %s853_s8, 64  ;;  %p573_p5 = scmp.lt.u32.totalorder %s853_s8, %s1052_s1 }
  0x23   : > { %p568_p1 = scmp.ne.s32.totalorder %s853_s8, %s567_s23  ;;  %p574_p6 = scmp.lt.u32.totalorder %s572_s30, %s567_s23 }
  0x24   : > { %p576_p10 = scmp.lt.u32.totalorder %s567_s23, %s853_s8 }
  0x25   : > { %p570_p3 = pnand %p870_p2, %p568_p1  ;;  %p575_p7 = por %p574_p6, %p573_p5 }
  0x27   : > { %p571_p4 = pneg %p570_p3  ;;  %p577_p13 = por %p576_p10, %p575_p7 }
  0x29   : > { %p578_p12 = pnand %p577_p13, %p571_p4 }
  0x2b   : > { %581 = shalt.err (!%p578_p12)
}
  0x2c   : > { %s582_s29 = scalar_lea.vmem %s857_s10, 64  ;;  %s745_s19 = smov [#allocation5]  }
  0x2d   : > { %p583_p1 = scmp.ne.s32.totalorder %s857_s10, %s582_s29  ;;  %s587_s7 = sshll.u32 %s745_s19, 4  ;;  %s588_s7 = int_to_ptr.vmem [resolvable:$false] %s587_s7 }
  0x2e   : > { %s589_s9 = scalar_lea.vmem %s588_s7, 128  ;;  %p590_p9 = scmp.lt.s32.totalorder %s857_s10, %s588_s7 }
  0x2f   : > { %p585_p3 = pnand %p583_p1, %p870_p2  ;;  %p591_p8 = scmp.lt.s32.totalorder %s589_s9, %s582_s29 }
  0x31   : > { %p586_p11 = pneg %p585_p3  ;;  %p592_p5 = por %p591_p8, %p590_p9 }
  0x33   : > { %p593_p6 = pnand %p592_p5, %p586_p11 }
  0x35   : > { %596 = shalt.err (!%p593_p6)
}
  0x36   : > { %508 = dma.hbm_to_vmem [thread:$0]  (!%p845_p0), %s853_s8, 64, %s857_s10, %s864_s22  }
  0x37   : > { %p480_p12 = scmp.ge.s32.totalorder %s743_s17, 1  ;;  %p217_p4 = scmp.lt.s32.totalorder %s743_s17, 3 }
  0x38   : > { %s471_s23 = sshll.u32 %s839_s28, 3  ;;  %s490_s11 = sshll.u32 %s739_s16, 7 }
  0x39   : > { %p896_p7 = pnand %p480_p12, %p217_p4  ;;  %s905_s19 = scalar_lea.hbm %s1034_s0, %s490_s11 }
  0x3a   : > { %s164_s7 = scalar_lea.vmem [#allocation2], %s471_s23  ;;  %s1055_s10 = sshll.u32 %s839_s28, 2 }
  0x3b   : > { %s1054_s30 = scalar_select %p896_p7, 1, 0 }
  0x3c   : > { %s174_s8 = sshll.u32 %s164_s7, 4  ;;  %s204_s9 = scalar_lea.vmem [#allocation7], %s1055_s10  ;;  %s909_s8 = int_to_ptr.vmem [resolvable:$true] %s174_s8 }
  0x3d   : > { %s212_s1 = sshll.u32 %s204_s9, 4  ;;  %s161_s20 = scalar_lea.sflag [#allocation3], %s839_s28  ;;  %s911_s1 = int_to_ptr.vmem [resolvable:$true] %s212_s1 }
  0x3e   : > { %s597_s16 = scalar_lea.hbm %s905_s19, 128  ;;  %s602_s29 = scalar_lea.hbm %s1034_s0, 256 }
  0x3f   : > { %p598_p8 = scmp.ne.s32.totalorder %s905_s19, %s597_s16  ;;  %p603_p10 = scmp.lt.u32.totalorder %s905_s19, %s1034_s0 }
  0x40   : > { %p604_p13 = scmp.lt.u32.totalorder %s602_s29, %s597_s16  ;;  %p606_p3 = scmp.lt.u32.totalorder %s597_s16, %s905_s19 }
  0x41   : > { %p600_p9 = pnand %p598_p8, %p870_p2 }
  0x42   : > { %p605_p1 = por %p604_p13, %p603_p10 }
  0x43   : > { %p601_p11 = pneg %p600_p9 }
  0x44   : > { %p607_p5 = por %p606_p3, %p605_p1 }
  0x46   : > { %p608_p6 = pnand %p607_p5, %p601_p11 }
  0x48   : > { %611 = shalt.err (!%p608_p6)
}
  0x49   : > { %s612_s28 = scalar_lea.vmem %s909_s8, 128  ;;  %s746_s7 = smov [#allocation2]  }
  0x4a   : > { %p613_p12 = scmp.ne.s32.totalorder %s909_s8, %s612_s28  ;;  %s617_s10 = sshll.u32 %s746_s7, 4  ;;  %s618_s10 = int_to_ptr.vmem [resolvable:$false] %s617_s10 }
  0x4b   : > { %s619_s26 = scalar_lea.vmem %s618_s10, 256  ;;  %p620_p9 = scmp.lt.s32.totalorder %s909_s8, %s618_s10 }
  0x4c   : > { %p615_p4 = pnand %p613_p12, %p870_p2  ;;  %p621_p7 = scmp.lt.s32.totalorder %s619_s26, %s612_s28 }
  0x4e   : > { %p616_p8 = pneg %p615_p4  ;;  %p622_p10 = por %p621_p7, %p620_p9 }
  0x50   : > { %p623_p13 = pnand %p622_p10, %p616_p8 }
  0x52   : > { %626 = shalt.err (!%p623_p13)
}
  0x53   : > { %505 = dma.hbm_to_vmem [thread:$0]  (!%p845_p0), %s905_s19, 128, %s909_s8, %s161_s20  }
  0x54   : > { %s627_s16 = scalar_lea.hbm %s862_s21, 64  ;;  %s632_s5 = scalar_lea.hbm %s1036_s2, 128 }
  0x55   : > { %p628_p11 = scmp.ne.s32.totalorder %s862_s21, %s627_s16  ;;  %p633_p7 = scmp.lt.u32.totalorder %s862_s21, %s1036_s2 }
  0x56   : > { %p634_p5 = scmp.lt.u32.totalorder %s632_s5, %s627_s16  ;;  %p636_p12 = scmp.lt.u32.totalorder %s627_s16, %s862_s21 }
  0x57   : > { %p630_p1 = pnand %p628_p11, %p870_p2 }
  0x58   : > { %p635_p6 = por %p634_p5, %p633_p7 }
  0x59   : > { %p631_p3 = pneg %p630_p1 }
  0x5a   : > { %p637_p4 = por %p636_p12, %p635_p6 }
  0x5c   : > { %p638_p8 = pnand %p637_p4, %p631_p3 }
  0x5e   : > { %641 = shalt.err (!%p638_p8)
}
  0x5f   : > { %s642_s20 = scalar_lea.vmem %s911_s1, 64  ;;  %s747_s19 = smov [#allocation7]  }
  0x60   : > { %p643_p9 = scmp.ne.s32.totalorder %s911_s1, %s642_s20  ;;  %s647_s8 = sshll.u32 %s747_s19, 4  ;;  %s648_s8 = int_to_ptr.vmem [resolvable:$false] %s647_s8 }
  0x61   : > { %s649_s28 = scalar_lea.vmem %s648_s8, 128  ;;  %p650_p11 = scmp.lt.s32.totalorder %s911_s1, %s648_s8 }
  0x62   : > { %p645_p10 = pnand %p643_p9, %p870_p2  ;;  %p651_p1 = scmp.lt.s32.totalorder %s649_s28, %s642_s20 }
  0x64   : > { %p646_p13 = pneg %p645_p10  ;;  %p652_p7 = por %p651_p1, %p650_p11 }
  0x66   : > { %p653_p5 = pnand %p652_p7, %p646_p13 }
  0x68   : > { %656 = shalt.err (!%p653_p5)
}
  0x69   : > { %511 = dma.hbm_to_vmem [thread:$0]  (!%p845_p0), %s862_s21, 64, %s911_s1, %s864_s22  }
  0x6a   : > { %p1056_p3 = scmp.ne.s32.totalorder %s1054_s30, 0 }
  0x6b   : > { %s960_s6 = sand.u32 (!%p1056_p3), 1, %s727_s13   ;;  %p1057_p2 = scmp.ne.s32.totalorder (!%p1056_p3), %s1047_s24, 0 }
  0x6c   : > { %221 = sbr.rel (%p1056_p3) target bundleno = 149 (0x95), region = 32  ;;  %s481_s7 = sshll.u32 (!%p1056_p3), %s960_s6, 3 }
  0x6d   : > { %s224_s10 = scalar_lea.sflag (!%p1056_p3), [#allocation3], %s960_s6  ;;  %s966_s26 = scalar_lea.vmem (!%p1056_p3), [#allocation2], %s481_s7 }
  0x73   : > { %710 = dma.done.wait (%p1057_p2), %s224_s10, 128  }
  0x74   : > { %712 = vsyncadd (%p1057_p2), %s224_s10, 4294967168  ;;  %s232_s1 = sand.u32 1, %s801_s18   ;;  %s482_s4 = sshll.u32 %s960_s6, 2 }
  0x75   : > { %s233_s21 = scalar_lea.sflag [#allocation6], %s232_s1  ;;  %s236_s22 = scalar_lea.vmem [#allocation5], %s482_s4 }
  0x76   : > { %714 = dma.done.wait (%p1057_p2), %s233_s21, 128  }
  0x77   : > { %716 = vsyncadd (%p1057_p2), %s233_s21, 4294967168  ;;  %v287_v0 = vlaneseq  ;;  %v748_v1 = vmov 1983009808   ;;  %v283_v9 = vld [vmem:[%s236_s22] sm:$0xf]  ;;  %s245_s18 = scalar_lea.vmem [#allocation7], %s482_s4 }
  0x78   : > { %v306_v2 = vunpack.c.l.s4 %v748_v1  ;;  %v284_v10 = vld [vmem:[%s245_s18] sm:$0xf]  ;;  %v282_v21 = vld [vmem:[%s966_s26] sm:$0xff]  ;;  %s277_s24 = scalar_lea.vmem [#allocation8], %s481_s7  ;;  %s493_s16 = sshll.u32 %s735_s15, 7 }
  0x79   : > { %v288_v3 = vshrl.u32 %v287_v0, 7  ;;  %v285_v11 = vmul.f32 %v284_v10, %v283_v9  ;;  %s340_s30 = sshll.u32 %s277_s24, 4  ;;  %s987_s5 = scalar_lea.hbm %s1037_s3, %s493_s16  ;;  %s982_s30 = int_to_ptr.vmem [resolvable:$true] %s340_s30 }
  0x7a   : > { %v307_v4 = vunpack.c.0.s8 %v306_v2  ;;  %s324_s29 = scalar_lea.sflag [#allocation4], %s960_s6  ;;  %s657_s23 = scalar_lea.vmem %s982_s30, 128 }
  0x7b   : > { %v289_v5 = vsub.s32 0, %v288_v3  ;;  %v293_v6 = vsub.s32 1, %v288_v3  ;;  %v297_v7 = vsub.s32 2, %v288_v3  ;;  %v301_v8 = vsub.s32 3, %v288_v3  ;;  %p658_p0 = scmp.ne.s32.totalorder %s982_s30, %s657_s23  ;;  %p1058_p6 = scmp.ne.s32.totalorder %s1048_s25, 0 }
  0x7c   : > { %v310_v12 = vsub.s32 %v307_v4, %v288_v3  ;;  %s749_s15 = smov [#allocation8]  }
  0x7d   : > { %v290_v13 = vrot.slane %v285_v11, %v289_v5  ;;  %v294_v14 = vrot.slane %v285_v11, %v293_v6  ;;  %v298_v15 = vrot.slane %v285_v11, %v297_v7  ;;  %v302_v16 = vrot.slane %v285_v11, %v301_v8  ;;  %p659_p12 = pnand %p658_p0, %p1058_p6  ;;  %s661_s20 = sshll.u32 %s749_s15, 4  ;;  %s662_s20 = int_to_ptr.vmem [resolvable:$false] %s661_s20 }
  0x7e   : > { %s663_s19 = scalar_lea.vmem %s662_s20, 256  ;;  %p664_p8 = scmp.lt.s32.totalorder %s982_s30, %s662_s20 }
  0x7f   : > { %v303_v17 = vcombine.low %v290_v13, %v294_v14  ;;  %v304_v18 = vcombine.low %v298_v15, %v302_v16  ;;  %p660_p4 = pneg %p659_p12  ;;  %p665_p9 = scmp.lt.s32.totalorder %s663_s19, %s657_s23 }
  0x81   : > { %v311_v19 = vrot.slane %v303_v17, %v310_v12  ;;  %v318_v20 = vrot.slane %v304_v18, %v310_v12  ;;  %p666_p10 = por %p665_p9, %p664_p8 }
  0x83   : > { %v319_v22 = vcombine.low %v311_v19, %v318_v20  ;;  %p667_p13 = pnand %p666_p10, %p660_p4 }
  0x85   : > { %v321_v23 = vadd.f32 %v319_v22, %v282_v21 }
  0x87   : > { %322 = vst [vmem:[%s277_s24] sm:$0xff] %v321_v23 }
  0x88   : > { %670 = shalt.err (!%p667_p13)
}
  0x89   : > { %s671_s8 = scalar_lea.hbm %s987_s5, 128  ;;  %s675_s7 = scalar_lea.hbm %s1037_s3, 256 }
  0x8a   : > { %p672_p11 = scmp.ne.s32.totalorder %s987_s5, %s671_s8  ;;  %p676_p5 = scmp.lt.u32.totalorder %s987_s5, %s1037_s3 }
  0x8b   : > { %p677_p3 = scmp.lt.u32.totalorder %s675_s7, %s671_s8  ;;  %p679_p0 = scmp.lt.u32.totalorder %s671_s8, %s987_s5 }
  0x8c   : > { %p673_p1 = pnand %p672_p11, %p1058_p6 }
  0x8d   : > { %p678_p2 = por %p677_p3, %p676_p5 }
  0x8e   : > { %p674_p7 = pneg %p673_p1 }
  0x8f   : > { %p680_p12 = por %p679_p0, %p678_p2 }
  0x91   : > { %p681_p4 = pnand %p680_p12, %p674_p7 }
  0x93   : > { %684 = shalt.err (!%p681_p4)
}
  0x94   : > { %500 = dma.vmem_to_hbm [thread:$0]  (%p1058_p6), %s982_s30, 128, %s987_s5, %s324_s29  }
  0x95 PF: > { %s352_s1 = sand.u32 1, %s723_s12   ;;  %p1059_p8 = scmp.ne.s32.totalorder %s1050_s27, 0 }
  0x96   : > { %p1060_p9 = scmp.ge.s32.totalorder %s743_s17, 2  ;;  %s353_s4 = scalar_lea.sflag [#allocation4], %s352_s1 }
  0x98   : > { %p513_p10 = pnand %p1060_p9, %p1059_p8 }
  0x9a   : > { %718 = dma.done.wait (!%p513_p10), %s353_s4, 128  }
  0x9b   : > { %720 = vsyncadd (!%p513_p10), %s353_s4, 4294967168  ;;  %s22_s17 = sadd.s32 1, %s743_s17   ;;  %s1061_s25 = sld [smem:[#allocation14_spill]] }
  0x9c   : > { %p19_p13 = scmp.ge.s32.totalorder %s22_s17, 4   ;;  %s1062_s15 = sld [smem:[#allocation12_spill]] }
  0x9d   : > { %s1063_s16 = sld [smem:[#allocation13_spill]]  ;;  %s1064_s12 = smov %s727_s13 }
  0x9e   : > { %s1065_s13 = smov %s731_s14  ;;  %21 = sbr.rel (!%p19_p13) target bundleno = 10 (0xa), region = 101 }
  0xa1   : > { %s1066_s14 = smov %s1061_s25 }
  0xa5   :  { %358 = vsyncpa [#allocation3], 1 }
  0xa6   :  { %360 = vsyncpa [#allocation3 + $0x1], 1 }
  0xa7   :  { %361 = vsyncpa [#allocation6], 1 }
  0xa8   :  { %363 = vsyncpa [#allocation6 + $0x1], 1 }
  0xa9   :  { %364 = vsyncpa [#allocation4], 1 }
  0xaa   :  { %366 = vsyncpa [#allocation4 + $0x1], 1 }

</bundles_post_ra>
